<compile_context>
chip_gen: v6e
topology: v6e:2x2x1
jax: 0.10.0
libtpu: 0.0.40
codegen_flags: <defaults>
</compile_context>

<pallas_src>
import functools

import jax
import jax.numpy as jnp
import numpy as np
from jax.experimental import pallas as pl
from jax.experimental.pallas import tpu as pltpu

_LANE = 128
_SUBLANE = 8


def _round_up(x: int, m: int) -> int:
    return ((x + m - 1) // m) * m


@functools.lru_cache(maxsize=None)
def _adaptive_pool_matrix(in_len: int, out_len: int, out_padded: int) -> np.ndarray:
    """Dense pooling matrix P (in_len, out_padded), f32.

    x @ P[:, :out_len] == AdaptiveAvgPool1d(out_len)(x).  Columns
    [out_len:out_padded) are zeros so the kernel output is lane-dense
    (last dim a multiple of 128 -> unmasked vector stores).
    """
    P = np.zeros((in_len, out_padded), dtype=np.float32)
    for i in range(out_len):
        start = (i * in_len) // out_len                 # floor
        end = -((-(i + 1) * in_len) // out_len)         # ceil
        P[start:end, i] = 1.0 / (end - start)
    return P


def _pool_kernel(x_ref, p_ref, y_ref):
    # (TC, L) @ (L, out_padded) -> (TC, out_padded) on the MXU, f32 accumulate.
    y_ref[...] = jnp.dot(
        x_ref[...], p_ref[...], preferred_element_type=jnp.float32
    ).astype(y_ref.dtype)


@functools.partial(jax.jit, static_argnums=(1,))
def compress_net_forward(x: jax.Array, output_size: int) -> jax.Array:
    """JAX/Pallas equivalent of CompressNet.forward for x of shape (C, L)."""
    C, L = x.shape

    # Lane-dense output width (padding columns of P are zero, sliced off below).
    out_p = _round_up(output_size, _LANE)
    P = jnp.asarray(_adaptive_pool_matrix(L, output_size, out_p))  # f32 weights

    # Channel tile: multiple of 8, capped at 512, and capped so a single
    # double-buffered x block stays around <= 8 MiB (fits v7x's smaller VMEM).
    vmem_cap_rows = max(_SUBLANE, ((8 * 1024 * 1024) // (L * 4)) // _SUBLANE * _SUBLANE)
    tc = min(512, _round_up(C, _SUBLANE), vmem_cap_rows)

    # Pad channels so every block is full-extent (no partial blocks / masks).
    c_pad = _round_up(C, tc)
    if c_pad != C:
        x = jnp.pad(x, ((0, c_pad - C), (0, 0)))
    grid = (c_pad // tc,)

    y_padded = pl.pallas_call(
        _pool_kernel,
        out_shape=jax.ShapeDtypeStruct((c_pad, out_p), x.dtype),
        grid_spec=pl.GridSpec(
            grid=grid,
            in_specs=[
                pl.BlockSpec((tc, L), lambda i: (i, 0)),        # x channel tile
                pl.BlockSpec((L, out_p), lambda i: (0, 0)),     # P, resident
            ],
            out_specs=pl.BlockSpec((tc, out_p), lambda i: (i, 0)),
        ),
        compiler_params=pltpu.CompilerParams(
            dimension_semantics=("parallel",),   # shard channel tiles across TCs
            vmem_limit_bytes=32 * 1024 * 1024,
        ),
    )(x, P)

    return y_padded[:C, :output_size]


def _reference_adaptive_avg_pool1d(x: np.ndarray, out_len: int) -> np.ndarray:
    """NumPy reference matching torch.nn.AdaptiveAvgPool1d semantics."""
    C, L = x.shape
    y = np.zeros((C, out_len), dtype=np.float32)
    for i in range(out_len):
        start = (i * L) // out_len
        end = -((-(i + 1) * L) // out_len)
        y[:, i] = x[:, start:end].mean(axis=1)
    return y


if __name__ == "__main__":
    # CompressNet has no learned parameters (only AdaptiveAvgPool1d); the seed
    # in __init__ does not affect the forward computation.
    key = jax.random.PRNGKey(0)
    k1, k2 = jax.random.split(key)

    # Case 1: the small shape implied by the module usage (non-divisible windows).
    C1, L1, out1 = 4, 16, 6
    x1 = jax.random.normal(k1, (C1, L1), dtype=jnp.float32)
    y1 = jax.block_until_ready(compress_net_forward(x1, out1))
    np.testing.assert_allclose(
        np.asarray(y1), _reference_adaptive_avg_pool1d(np.asarray(x1), out1),
        rtol=1e-5, atol=1e-5)

    # Case 2: enough channels to exercise channel tiling / padding (grid > 1).
    C2, L2, out2 = 520, 384, 50
    x2 = jax.random.normal(k2, (C2, L2), dtype=jnp.float32)
    y2 = jax.block_until_ready(compress_net_forward(x2, out2))
    np.testing.assert_allclose(
        np.asarray(y2), _reference_adaptive_avg_pool1d(np.asarray(x2), out2),
        rtol=1e-5, atol=1e-5)

    print("KERNEL_OK")
</pallas_src>

<mosaic_0001>
module attributes {stable_mosaic.version = 11 : i64} {
  func.func @_pool_kernel(%arg0: i32, %arg1: memref<8x16xf32, #tpu.memory_space<vmem>>, %arg2: memref<16x128xf32, #tpu.memory_space<vmem>>, %arg3: memref<8x128xf32, #tpu.memory_space<vmem>>) attributes {dimension_semantics = [#tpu.dimension_semantics<parallel>], iteration_bounds = array<i64: 1>, scalar_prefetch = 0 : i64, scratch_operands = 0 : i64, tpu.core_type = #tpu.core_type<tc>, window_params = [{transform_indices = @transform_0, window_bounds = array<i64: 8, 16>}, {pipeline_mode = #tpu.pipeline_mode<synchronous>, transform_indices = @transform_1, window_bounds = array<i64: 16, 128>}, {transform_indices = @transform_2, window_bounds = array<i64: 8, 128>}]} {
    %c0 = arith.constant 0 : index
    %c0_0 = arith.constant 0 : index
    %0 = vector.load %arg1[%c0, %c0_0] : memref<8x16xf32, #tpu.memory_space<vmem>>, vector<8x16xf32>
    %c0_1 = arith.constant 0 : index
    %c0_2 = arith.constant 0 : index
    %1 = vector.load %arg2[%c0_1, %c0_2] : memref<16x128xf32, #tpu.memory_space<vmem>>, vector<16x128xf32>
    %cst = arith.constant dense<0.000000e+00> : vector<8x128xf32>
    %2 = tpu.matmul %0, %1, %cst {dimension_numbers = #tpu.dot_dimension_numbers<[1], [0], [0], [1], [0, 0, 1, 1], [], []>} : vector<8x16xf32>, vector<16x128xf32>, vector<8x128xf32> -> vector<8x128xf32>
    %c0_3 = arith.constant 0 : index
    %c0_4 = arith.constant 0 : index
    %3 = vector.load %arg3[%c0_3, %c0_4] : memref<8x128xf32, #tpu.memory_space<vmem>>, vector<8x128xf32>
    tpu.vector_store %arg3[%c0_3, %c0_4], %2 {strides = array<i32>} : memref<8x128xf32, #tpu.memory_space<vmem>>, vector<8x128xf32>,
    return
  }
  func.func @transform_0(%arg0: i32) -> (i32, i32) {
    %c0_i32 = arith.constant 0 : i32
    %c0_i32_0 = arith.constant 0 : i32
    return %arg0, %c0_i32 : i32, i32
  }
  func.func @transform_1(%arg0: i32) -> (i32, i32) {
    %c0_i32 = arith.constant 0 : i32
    %c0_i32_0 = arith.constant 0 : i32
    %c0_i32_1 = arith.constant 0 : i32
    return %c0_i32, %c0_i32_0 : i32, i32
  }
  func.func @transform_2(%arg0: i32) -> (i32, i32) {
    %c0_i32 = arith.constant 0 : i32
    %c0_i32_0 = arith.constant 0 : i32
    return %arg0, %c0_i32 : i32, i32
  }
}

</mosaic_0001>

<bundles_post_ra>
// kernel: compress_net_forward.1
= control target key start
LH: loop header
LB: loop body
LE: loop exit
PB: predicated region body
PF: predicated region fallthrough
CT: control target
= control target key end

     0   :  { %7 = vsyncpa [#allocation3], 0  ;;  %s146_s9 = smov [#allocation2]   ;;  %s175_s0 = inlined_call_operand.vmem [shape: f32[8,16], index: 0, kind: input, shape index: {}]   ;;  %s176_s1 = inlined_call_operand.hbm [shape: f32[16,128], index: 1, kind: input, shape index: {}]   ;;  %s177_s2 = inlined_call_operand.vmem [shape: f32[8,128], index: 2, kind: output, shape index: {}]  }
   0x1   :  { %s15_s10 = sshll.u32 %s146_s9, 4  ;;  %s16_s10 = int_to_ptr.vmem [resolvable:$true] %s15_s10 }
   0x2   :  { %s132_s11 = scalar_lea.vmem %s16_s10, 256  ;;  %p137_p1 = scmp.lt.s32.totalorder %s16_s10, %s16_s10 }
   0x3   :  { %p133_p0 = scmp.ne.s32.totalorder %s16_s10, %s132_s11  ;;  %p138_p2 = scmp.lt.s32.totalorder %s132_s11, %s132_s11 }
   0x5   :  { %p139_p3 = por %p138_p2, %p137_p1 }
   0x7   :  { %p140_p4 = pnand %p139_p3, %p133_p0 }
   0x9   :  { %143 = shalt.err (!%p140_p4)
}
   0xa   :  { %s147_s12 = smov 128   ;;  %s148_s13 = smov 8  }
   0xb   :  { %21 = dma.hbm_to_vmem [thread:$0]  %s176_s1, 256, %s16_s10, [#allocation3], %s147_s12, %s147_s12, %s148_s13  }
   0xc   :  { %144 = dma.done.wait [#allocation3], 256  }
   0xd   :  { %145 = vsyncadd [#allocation3], 4294967040  ;;  %v149_v0 = vmov 0.0   ;;  %vm150_vm0 = vmmov 0   ;;  %v27_v1 = vld [vmem:[#allocation2 + $0x8] sm:$0xff]  ;;  %v26_v2 = vld [vmem:[#allocation2] sm:$0xff] }
   0xe   :  { %112 = vmatprep.subr.mxu0 %v149_v0  ;;  %116 = vmatprep.mubr.msk.f32.mxu0 %vm150_vm0, %v149_v0  ;;  %v25_v3 = vld [vmem:[%s175_s0] sm:$0xff]  ;;  %vm28_vm1 = vcmask 130048  }
   0xf   :  { %113 = vmatpush3.msra.mxu0 %v27_v1 }
  0x10   :  { %114 = vmatprep.subr.mxu0 %v149_v0 }
  0x11   :  { %115 = vmatpush3.msra.mxu0 %v26_v2 }
  0x12   :  { %117 = vmatmul.mubr.msk.f32.vlgmr.msra.gmra.mxu0 %vm28_vm1, %v25_v3 }
  0xd2   :  { %v98_v4 = vpop.f32.mrf.mxu0 }
  0xd3   :  { %102 = vst [vmem:[%s177_s2] sm:$0xff] %v98_v4 }
  0xd4   :  { %v118_v5 = vpop.f32.mrf.mxu0 }
  0xd5   :  { %107 = vsyncpa [#allocation3], 1 }

</bundles_post_ra>
